<compile_context>
chip_gen: v5e
topology: v5e:2x2
jax: 0.10.0
libtpu: 0.0.40
codegen_flags: <defaults>
</compile_context>

<pallas_src>
import jax
import jax.numpy as jnp
from jax.experimental import pallas as pl
from jax.experimental.pallas import tpu as pltpu


def alert_kernel(x_ref, w1_ref, b1_ref, w2_ref, b2_ref, w3_ref, b3_ref, o_ref):
    # x tile arrives in native (tb, F2) layout; put batch on lanes in-kernel.
    xT = jnp.transpose(x_ref[...])                      # (F2, tb), XLU transpose

    # L1: Linear(2H -> 2H)  (Dropout = identity in eval) + ReLU, as W1 @ x^T
    h1 = jnp.dot(w1_ref[...], xT, preferred_element_type=jnp.float32)
    h1 = jnp.maximum(h1 + b1_ref[...], 0.0)             # (F2, tb); bias column broadcasts

    # L2: Linear(2H -> H) + ReLU
    h2 = jnp.dot(w2_ref[...], h1.astype(w2_ref.dtype),
                 preferred_element_type=jnp.float32)
    h2 = jnp.maximum(h2 + b2_ref[...], 0.0)             # (H, tb)

    # L3: Linear(H -> 1) as a VPU multiply + cross-sublane reduction; keeps the
    # MXU free and lands the result directly on the lane axis (lane-dense store).
    z = jnp.sum(h2 * w3_ref[...], axis=0, keepdims=True)  # (1, tb)
    z = z + b3_ref[0, 0]                                   # scalar bias from SMEM

    # Sigmoid via tanh (EUP): sigmoid(z) = 0.5 * tanh(z/2) + 0.5
    o_ref[...] = (0.5 * jnp.tanh(0.5 * z) + 0.5).astype(o_ref.dtype)


def _choose_batch_tile(B, tb):
    """Pick the batch tile.  Multi-tile blocks must be %128 on the output lane
    axis; keep >= 2 grid steps when possible (v7x has 2 TensorCores)."""
    if B < 256:
        return B                                # single full-extent tile (any B)
    tbe = min(tb, B // 2)                       # guarantee >= 2 grid steps
    tbe = max(128, (tbe // 128) * 128)          # lane-dense output blocks need %128
    return tbe


def alert_forward(x, w1, b1, w2, b2, w3, b3, *, tb=2048,
                  compute_dtype=jnp.bfloat16, vmem_limit_bytes=None,
                  single_buffer_weights=None):
    """Alert MLP forward.

    x : (B, 2H) float32
    Weights in native PyTorch nn.Linear layout:
      w1 (2H, 2H), b1 (2H,);  w2 (H, 2H), b2 (H,);  w3 (1, H), b3 (1,)
    Returns (B, 1) float32 probabilities.
    """
    B, F2 = x.shape
    H = w2.shape[0]
    assert w1.shape == (F2, F2) and w2.shape == (H, F2) and w3.shape == (1, H)

    cdtype = jnp.dtype(compute_dtype if compute_dtype is not None else x.dtype)
    if x.dtype != cdtype:
        x = x.astype(cdtype)        # free if it fuses with the producer of x upstream
    if w1.dtype != cdtype:
        w1 = w1.astype(cdtype)
    if w2.dtype != cdtype:
        w2 = w2.astype(cdtype)

    b1c = b1.reshape(F2, 1).astype(jnp.float32)   # bias columns (broadcast over lanes)
    b2c = b2.reshape(H, 1).astype(jnp.float32)
    w3c = jnp.transpose(w3).astype(jnp.float32)   # (H, 1) column for the VPU reduction
    b3s = b3.reshape(1, 1).astype(jnp.float32)    # scalar -> SMEM

    tb_eff = _choose_batch_tile(B, tb)
    grid = (pl.cdiv(B, tb_eff),)                  # ragged last tile handled by overhang

    itemsize = cdtype.itemsize
    resident_w_bytes = (w1.size + w2.size) * itemsize
    if single_buffer_weights is None:
        # Buffered(1) only matters once the resident weights are sizeable.
        single_buffer_weights = resident_w_bytes > (4 << 20)

    def _resident_spec(shape):
        index_map = lambda i: (0,) * len(shape)
        if single_buffer_weights:
            try:
                return pl.BlockSpec(shape, index_map, pipeline_mode=pl.Buffered(1))
            except TypeError:  # older jax without pipeline_mode kwarg
                pass
        return pl.BlockSpec(shape, index_map)

    # ---- explicit VMEM budget (buffer-count and generation aware) -----------
    wbuf = 1 if single_buffer_weights else 2
    if vmem_limit_bytes is None:
        est = (resident_w_bytes * wbuf                 # resident weight buffers
               + (F2 + 2 * H) * 4 * wbuf               # b1 / b2 / w3 columns
               + 2 * tb_eff * F2 * itemsize            # double-buffered x tiles
               + 2 * tb_eff * 4                        # double-buffered output rows
               + tb_eff * F2 * itemsize                # in-kernel x^T copy
               + (F2 + H) * tb_eff * 4)                # live h1 / h2 f32 intermediates
        need = int(est * 1.5) + (2 << 20)
        if need > (16 << 20):                          # v5e scoped default (v6e/v7x: 32 MiB)
            cap = 48 << 20                             # safe fallback (<= 0.75 * v7x 64 MiB)
            try:
                cap = int(0.75 * pltpu.get_tpu_info().vmem_capacity_bytes)
            except Exception:
                pass
            vmem_limit_bytes = int(min(need, cap))

    cp_kwargs = dict(dimension_semantics=("parallel",))
    if vmem_limit_bytes is not None:
        cp_kwargs["vmem_limit_bytes"] = int(vmem_limit_bytes)

    out = pl.pallas_call(
        alert_kernel,
        out_shape=jax.ShapeDtypeStruct((1, B), jnp.float32),
        grid_spec=pltpu.PrefetchScalarGridSpec(
            num_scalar_prefetch=0,
            grid=grid,
            in_specs=[
                pl.BlockSpec((tb_eff, F2), lambda i: (i, 0)),       # x tile (native layout)
                _resident_spec((F2, F2)),                           # W1 (out, in)
                _resident_spec((F2, 1)),                            # b1 column
                _resident_spec((H, F2)),                            # W2 (out, in)
                _resident_spec((H, 1)),                             # b2 column
                _resident_spec((H, 1)),                             # w3 column
                pl.BlockSpec(memory_space=pltpu.MemorySpace.SMEM),  # b3 scalar
            ],
            out_specs=pl.BlockSpec((1, tb_eff), lambda i: (0, i)),  # lane-dense row
        ),
        compiler_params=pltpu.CompilerParams(**cp_kwargs),
    )(x, w1, b1c, w2, b2c, w3c, b3s)

    return out[0, :].reshape(B, 1)


def reference_forward(x, w1, b1, w2, b2, w3, b3):
    # PyTorch semantics: y = x @ W.T + b
    h1 = jnp.maximum(x @ w1.T + b1, 0.0)
    h2 = jnp.maximum(h1 @ w2.T + b2, 0.0)
    return jax.nn.sigmoid(h2 @ w3.T + b3)


if __name__ == "__main__":
    hidden_size = 32
    F2 = hidden_size * 2

    key = jax.random.PRNGKey(0)
    kx, k1, kb1, k2, kb2, k3, kb3, kx2 = jax.random.split(key, 8)

    # Deterministic synthetic parameters, PyTorch nn.Linear layout (out, in).
    w1 = jax.random.normal(k1, (F2, F2), jnp.float32) / jnp.sqrt(F2)
    b1 = jax.random.normal(kb1, (F2,), jnp.float32) * 0.01
    w2 = jax.random.normal(k2, (hidden_size, F2), jnp.float32) / jnp.sqrt(F2)
    b2 = jax.random.normal(kb2, (hidden_size,), jnp.float32) * 0.01
    w3 = jax.random.normal(k3, (1, hidden_size), jnp.float32) / jnp.sqrt(hidden_size)
    b3 = jax.random.normal(kb3, (1,), jnp.float32) * 0.01

    # 1) Small single-tile batch, exact f32 compute path.
    B = 8
    x = jax.random.normal(kx, (B, F2), jnp.float32)
    out = jax.block_until_ready(
        alert_forward(x, w1, b1, w2, b2, w3, b3, compute_dtype=jnp.float32))
    ref = reference_forward(x, w1, b1, w2, b2, w3, b3)
    assert out.shape == (B, 1)
    assert jnp.allclose(out, ref, atol=2e-5, rtol=1e-4), "mismatch (single tile, f32)"

    # 2) Ragged multi-tile batch (cdiv grid + block overhang), exact f32 path.
    B2 = 300
    x2 = jax.random.normal(kx2, (B2, F2), jnp.float32)
    out2 = jax.block_until_ready(
        alert_forward(x2, w1, b1, w2, b2, w3, b3, compute_dtype=jnp.float32))
    ref2 = reference_forward(x2, w1, b1, w2, b2, w3, b3)
    assert out2.shape == (B2, 1)
    assert jnp.allclose(out2, ref2, atol=2e-5, rtol=1e-4), "mismatch (tiled, f32)"

    # 3) Default bf16 compute path (halves HBM traffic on x); looser tolerance.
    out3 = jax.block_until_ready(alert_forward(x2, w1, b1, w2, b2, w3, b3))
    assert out3.shape == (B2, 1)
    assert jnp.allclose(out3, ref2, atol=4e-2, rtol=4e-2), "mismatch (tiled, bf16)"

    print("KERNEL_OK")
</pallas_src>

<mosaic_0001>
module attributes {stable_mosaic.version = 11 : i64} {
  func.func @alert_kernel(%arg0: i32, %arg1: memref<8x64xf32, #tpu.memory_space<vmem>>, %arg2: memref<64x64xf32, #tpu.memory_space<vmem>>, %arg3: memref<64x1xf32, #tpu.memory_space<vmem>>, %arg4: memref<32x64xf32, #tpu.memory_space<vmem>>, %arg5: memref<32x1xf32, #tpu.memory_space<vmem>>, %arg6: memref<32x1xf32, #tpu.memory_space<vmem>>, %arg7: memref<1x1xf32, #tpu.memory_space<smem>>, %arg8: memref<1x8xf32, #tpu.memory_space<vmem>>) attributes {dimension_semantics = [#tpu.dimension_semantics<parallel>], iteration_bounds = array<i64: 1>, scalar_prefetch = 0 : i64, scratch_operands = 0 : i64, tpu.core_type = #tpu.core_type<tc>, window_params = [{transform_indices = @transform_0, window_bounds = array<i64: 8, 64>}, {pipeline_mode = #tpu.pipeline_mode<synchronous>, transform_indices = @transform_1, window_bounds = array<i64: 64, 64>}, {pipeline_mode = #tpu.pipeline_mode<synchronous>, transform_indices = @transform_2, window_bounds = array<i64: 64, 1>}, {pipeline_mode = #tpu.pipeline_mode<synchronous>, transform_indices = @transform_3, window_bounds = array<i64: 32, 64>}, {pipeline_mode = #tpu.pipeline_mode<synchronous>, transform_indices = @transform_4, window_bounds = array<i64: 32, 1>}, {pipeline_mode = #tpu.pipeline_mode<synchronous>, transform_indices = @transform_5, window_bounds = array<i64: 32, 1>}, {transform_indices = @transform_6, window_bounds = array<i64: 1, 1>}, {transform_indices = @transform_7, window_bounds = array<i64: 1, 8>}]} {
    %c0 = arith.constant 0 : index
    %c0_0 = arith.constant 0 : index
    %0 = vector.load %arg1[%c0, %c0_0] : memref<8x64xf32, #tpu.memory_space<vmem>>, vector<8x64xf32>
    %1 = tpu.transpose %0, [1, 0] : vector<8x64xf32> -> vector<64x8xf32>
    %c0_1 = arith.constant 0 : index
    %c0_2 = arith.constant 0 : index
    %2 = vector.load %arg2[%c0_1, %c0_2] : memref<64x64xf32, #tpu.memory_space<vmem>>, vector<64x64xf32>
    %cst = arith.constant dense<0.000000e+00> : vector<64x8xf32>
    %3 = tpu.matmul %2, %1, %cst {dimension_numbers = #tpu.dot_dimension_numbers<[1], [0], [0], [1], [0, 0, 1, 1], [], []>} : vector<64x64xf32>, vector<64x8xf32>, vector<64x8xf32> -> vector<64x8xf32>
    %c0_3 = arith.constant 0 : index
    %c0_4 = arith.constant 0 : index
    %4 = vector.load %arg3[%c0_3, %c0_4] : memref<64x1xf32, #tpu.memory_space<vmem>>, vector<64x1xf32>
    %5 = vector.broadcast %4 : vector<64x1xf32> to vector<64x8xf32>
    %6 = arith.addf %3, %5 : vector<64x8xf32>
    %cst_5 = arith.constant 0.000000e+00 : f32
    %7 = vector.broadcast %cst_5 : f32 to vector<64x8xf32>
    %8 = arith.maximumf %6, %7 : vector<64x8xf32>
    %c0_6 = arith.constant 0 : index
    %c0_7 = arith.constant 0 : index
    %9 = vector.load %arg4[%c0_6, %c0_7] : memref<32x64xf32, #tpu.memory_space<vmem>>, vector<32x64xf32>
    %cst_8 = arith.constant dense<0.000000e+00> : vector<32x8xf32>
    %10 = tpu.matmul %9, %8, %cst_8 {dimension_numbers = #tpu.dot_dimension_numbers<[1], [0], [0], [1], [0, 0, 1, 1], [], []>} : vector<32x64xf32>, vector<64x8xf32>, vector<32x8xf32> -> vector<32x8xf32>
    %c0_9 = arith.constant 0 : index
    %c0_10 = arith.constant 0 : index
    %11 = vector.load %arg5[%c0_9, %c0_10] : memref<32x1xf32, #tpu.memory_space<vmem>>, vector<32x1xf32>
    %12 = vector.broadcast %11 : vector<32x1xf32> to vector<32x8xf32>
    %13 = arith.addf %10, %12 : vector<32x8xf32>
    %cst_11 = arith.constant 0.000000e+00 : f32
    %14 = vector.broadcast %cst_11 : f32 to vector<32x8xf32>
    %15 = arith.maximumf %13, %14 : vector<32x8xf32>
    %c0_12 = arith.constant 0 : index
    %c0_13 = arith.constant 0 : index
    %16 = vector.load %arg6[%c0_12, %c0_13] : memref<32x1xf32, #tpu.memory_space<vmem>>, vector<32x1xf32>
    %17 = vector.broadcast %16 : vector<32x1xf32> to vector<32x8xf32>
    %18 = arith.mulf %15, %17 : vector<32x8xf32>
    %cst_14 = arith.constant dense<0.000000e+00> : vector<8xf32>
    %19 = vector.multi_reduction <add>, %18, %cst_14 [0] : vector<32x8xf32> to vector<8xf32>
    %20 = vector.shape_cast %19 : vector<8xf32> to vector<1x8xf32>
    %c0_15 = arith.constant 0 : index
    %c0_16 = arith.constant 0 : index
    %21 = memref.load %arg7[%c0_15, %c0_16] : memref<1x1xf32, #tpu.memory_space<smem>>
    %22 = vector.broadcast %21 : f32 to vector<1x8xf32>
    %23 = arith.addf %20, %22 : vector<1x8xf32>
    %cst_17 = arith.constant 5.000000e-01 : f32
    %24 = vector.broadcast %cst_17 : f32 to vector<1x8xf32>
    %25 = arith.mulf %24, %23 : vector<1x8xf32>
    %26 = math.tanh %25 : vector<1x8xf32>
    %cst_18 = arith.constant 5.000000e-01 : f32
    %27 = vector.broadcast %cst_18 : f32 to vector<1x8xf32>
    %28 = arith.mulf %27, %26 : vector<1x8xf32>
    %cst_19 = arith.constant 5.000000e-01 : f32
    %29 = vector.broadcast %cst_19 : f32 to vector<1x8xf32>
    %30 = arith.addf %28, %29 : vector<1x8xf32>
    %c0_20 = arith.constant 0 : index
    %c0_21 = arith.constant 0 : index
    %31 = vector.load %arg8[%c0_20, %c0_21] : memref<1x8xf32, #tpu.memory_space<vmem>>, vector<1x8xf32>
    tpu.vector_store %arg8[%c0_20, %c0_21], %30 {strides = array<i32>} : memref<1x8xf32, #tpu.memory_space<vmem>>, vector<1x8xf32>,
    return
  }
  func.func @transform_0(%arg0: i32) -> (i32, i32) {
    %c0_i32 = arith.constant 0 : i32
    %c0_i32_0 = arith.constant 0 : i32
    return %arg0, %c0_i32 : i32, i32
  }
  func.func @transform_1(%arg0: i32) -> (i32, i32) {
    %c0_i32 = arith.constant 0 : i32
    %c0_i32_0 = arith.constant 0 : i32
    %c0_i32_1 = arith.constant 0 : i32
    return %c0_i32, %c0_i32_0 : i32, i32
  }
  func.func @transform_2(%arg0: i32) -> (i32, i32) {
    %c0_i32 = arith.constant 0 : i32
    %c0_i32_0 = arith.constant 0 : i32
    %c0_i32_1 = arith.constant 0 : i32
    return %c0_i32, %c0_i32_0 : i32, i32
  }
  func.func @transform_3(%arg0: i32) -> (i32, i32) {
    %c0_i32 = arith.constant 0 : i32
    %c0_i32_0 = arith.constant 0 : i32
    %c0_i32_1 = arith.constant 0 : i32
    return %c0_i32, %c0_i32_0 : i32, i32
  }
  func.func @transform_4(%arg0: i32) -> (i32, i32) {
    %c0_i32 = arith.constant 0 : i32
    %c0_i32_0 = arith.constant 0 : i32
    %c0_i32_1 = arith.constant 0 : i32
    return %c0_i32, %c0_i32_0 : i32, i32
  }
  func.func @transform_5(%arg0: i32) -> (i32, i32) {
    %c0_i32 = arith.constant 0 : i32
    %c0_i32_0 = arith.constant 0 : i32
    %c0_i32_1 = arith.constant 0 : i32
    return %c0_i32, %c0_i32_0 : i32, i32
  }
  func.func @transform_6(%arg0: i32) -> (i32, i32) {
    %c0_i32 = arith.constant 0 : i32
    %c0_i32_0 = arith.constant 0 : i32
    %c0_i32_1 = arith.constant 0 : i32
    return %c0_i32, %c0_i32_0 : i32, i32
  }
  func.func @transform_7(%arg0: i32) -> (i32, i32) {
    %c0_i32 = arith.constant 0 : i32
    %c0_i32_0 = arith.constant 0 : i32
    return %c0_i32, %arg0 : i32, i32
  }
}

</mosaic_0001>

<bundles_post_ra>
// kernel: tpu_custom_call.1
= control target key start
LH: loop header
LB: loop body
LE: loop exit
PB: predicated region body
PF: predicated region fallthrough
CT: control target
= control target key end

     0   :  { %vm85_vm0 = vcmask 523264   ;;  %v357_v2 = vmov 0   ;;  %s506_s0 = inlined_call_operand.vmem [shape: f32[8,64], index: 0, kind: input, shape index: {}]   ;;  %s507_s1 = inlined_call_operand.vmem [shape: f32[64,64], index: 1, kind: input, shape index: {}]   ;;  %s508_s2 = inlined_call_operand.vmem [shape: f32[64,1], index: 2, kind: input, shape index: {}]   ;;  %s509_s3 = inlined_call_operand.vmem [shape: f32[32,64], index: 3, kind: input, shape index: {}]   ;;  %s510_s4 = inlined_call_operand.vmem [shape: f32[32,1], index: 4, kind: input, shape index: {}]   ;;  %s511_s5 = inlined_call_operand.vmem [shape: f32[32,1], index: 5, kind: input, shape index: {}]   ;;  %s512_s6 = inlined_call_operand.<no memory space> [shape: f32[1,1], index: 6, kind: input, shape index: {}]   ;;  %s513_s7 = inlined_call_operand.hbm [shape: f32[1,8], index: 7, kind: output, shape index: {}]  }
   0x1   :  { %v28_v0 = vld [vmem:[%s506_s0] sm:$0xff]  ;;  %v44_v1 = vld [vmem:[%s508_s2 + $0x38] sm:$0xff]  ;;  %326 = vset.pattern.permute.xlu0 %v357_v2  ;;  %v42_v4 = vld [vmem:[%s508_s2 + $0x28] sm:$0xff]  ;;  %327 = vset.pattern.permute.xlu1 %v357_v2 }
   0x2   :  { %315 = vmatpush.xpose.msk.msra.mxu2 %vm85_vm0, %v28_v0  ;;  %v33_v3 = vld [vmem:[%s507_s1 + $0x20] sm:$0xff]  ;;  %82 = vperm.xlu0 %326, %v44_v1   ;;  %v40_v6 = vld [vmem:[%s508_s2 + $0x18] sm:$0xff] }
   0x3   :  { %302 = vmatpush.xpose.msk.msra.mxu0 %vm85_vm0, %v28_v0  ;;  %v29_v5 = vld [vmem:[%s507_s1] sm:$0xff]  ;;  %328 = vset.pattern.permute.xlu2 %v357_v2 }
   0x4   :  { %72 = vperm.xlu1 %327, %v42_v4  }
   0x5   :  { %307 = vmatmul.msk.f32.vlgmr.msra.gmra.mxu2 %vm85_vm0, %v33_v3 }
   0x6   :  { %303 = vmatmul.msk.f32.vlgmr.msra.gmra.mxu0 %vm85_vm0, %v29_v5 }
   0x7   :  { %13 = vsyncpa [#allocation4], 0  ;;  %v43_v7 = vld [vmem:[%s508_s2 + $0x30] sm:$0xff]  ;;  %62 = vperm.xlu2 %328, %v40_v6   ;;  %v34_v8 = vld [vmem:[%s507_s1 + $0x28] sm:$0xff]  ;;  %vm263_vm1 = vcmask 64512   ;;  %s358_s8 = smov [#allocation3]  }
   0x8   :  { %v41_v9 = vld [vmem:[%s508_s2 + $0x20] sm:$0xff]  ;;  %v30_v10 = vld [vmem:[%s507_s1 + $0x8] sm:$0xff]  ;;  %v39_v11 = vld [vmem:[%s508_s2 + $0x10] sm:$0xff]  ;;  %s291_s0 = sshll.u32 %s358_s8, 4  ;;  %s293_s10 = sshll.u32 %s513_s7, 4  ;;  %vm284_vm2 = vcmask 57344   ;;  %s292_s0 = int_to_ptr.vmem [resolvable:$true] %s291_s0  ;;  %s294_s10 = int_to_ptr.hbm [resolvable:$true] %s293_s10 }
   0x9   :  { %v38_v12 = vld [vmem:[%s508_s2 + $0x8] sm:$0xff]  ;;  %v35_v13 = vld [vmem:[%s507_s1 + $0x30] sm:$0xff]  ;;  %v37_v14 = vld [vmem:[%s508_s2] sm:$0xff] }
   0xa   :  { %77 = vperm.xlu0 %326, %v43_v7   ;;  %v31_v15 = vld [vmem:[%s507_s1 + $0x10] sm:$0xff]  ;;  %v166_v16 = vld [vmem:[%s510_s4] sm:$0xff]  ;;  %v167_v17 = vld [vmem:[%s510_s4 + $0x8] sm:$0xff] }
   0xb   :  { %v36_v18 = vld [vmem:[%s507_s1 + $0x38] sm:$0xff]  ;;  %v168_v19 = vld [vmem:[%s510_s4 + $0x10] sm:$0xff]  ;;  %v235_v22 = vld [vmem:[%s511_s5] sm:$0xff] }
   0xc   :  { %67 = vperm.xlu1 %327, %v41_v9   ;;  %v32_v20 = vld [vmem:[%s507_s1 + $0x18] sm:$0xff]  ;;  %v236_v23 = vld [vmem:[%s511_s5 + $0x8] sm:$0xff]  ;;  %v237_v24 = vld [vmem:[%s511_s5 + $0x10] sm:$0xff] }
   0xd   :  { %308 = vmatmul.msk.f32.gmra.mxu2 %vm85_vm0, %v34_v8  ;;  %v169_v21 = vld [vmem:[%s510_s4 + $0x18] sm:$0xff]  ;;  %v162_v58 = vld [vmem:[%s509_s3] sm:$0xff]  ;;  %v163_v59 = vld [vmem:[%s509_s3 + $0x8] sm:$0xff] }
   0xe   :  { %304 = vmatmul.msk.f32.gmra.mxu0 %vm85_vm0, %v30_v10  ;;  %v238_v25 = vld [vmem:[%s511_s5 + $0x18] sm:$0xff]  ;;  %v164_v60 = vld [vmem:[%s509_s3 + $0x10] sm:$0xff] }
   0xf   :  { %57 = vperm.xlu2 %328, %v39_v11   ;;  %v165_v61 = vld [vmem:[%s509_s3 + $0x18] sm:$0xff] }
  0x12   :  { %52 = vperm.xlu0 %326, %v38_v12  }
  0x14   :  { %47 = vperm.xlu1 %327, %v37_v14  }
  0x15   :  { %309 = vmatmul.msk.f32.gmra.mxu2 %vm85_vm0, %v35_v13 }
  0x16   :  { %305 = vmatmul.msk.f32.gmra.mxu0 %vm85_vm0, %v31_v15 }
  0x17   :  { %172 = vperm.xlu2 %328, %v166_v16  }
  0x1a   :  { %177 = vperm.xlu0 %326, %v167_v17  }
  0x1c   :  { %182 = vperm.xlu1 %327, %v168_v19  }
  0x1d   :  { %310 = vmatmul.msk.f32.gmra.mxu2 %vm85_vm0, %v36_v18 }
  0x1e   :  { %306 = vmatmul.msk.f32.gmra.mxu0 %vm85_vm0, %v32_v20 }
  0x1f   :  { %187 = vperm.xlu2 %328, %v169_v21  }
  0x22   :  { %241 = vperm.xlu0 %326, %v235_v22  }
  0x24   :  { %246 = vperm.xlu1 %327, %v236_v23  }
  0x27   :  { %251 = vperm.xlu2 %328, %v237_v24  }
  0x2a   :  { %256 = vperm.xlu0 %326, %v238_v25  }
  0x61   :  { %v63_v34 = vpop.permute.xlu2 %62 }
  0x69   :  { %v58_v47 = vpop.permute.xlu2 %57 }
  0x71   :  { %v173_v62 = vpop.permute.xlu2 %172 }
  0x74   :  { %v83_v30 = vpop.permute.xlu0 %82 }
  0x76   :  { %v73_v31 = vpop.permute.xlu1 %72 }
  0x79   :  { %v188_v2 = vpop.permute.xlu2 %187 }
  0x7c   :  { %v78_v35 = vpop.permute.xlu0 %77 }
  0x7e   :  { %v68_v39 = vpop.permute.xlu1 %67 }
  0x81   :  { %v252_v14 = vpop.permute.xlu2 %251 }
  0x83   :  { %v130_v26 = vpop.f32.mrf.mxu0 }
  0x84   :  { %v53_v50 = vpop.permute.xlu0 %52 }
  0x86   :  { %v48_v53 = vpop.permute.xlu1 %47 }
  0x87   :  { %v131_v54 = vadd.f32 %v130_v26, %v48_v53 }
  0x88   :  { %v142_v27 = vpop.f32.mrf.mxu2 }
  0x89   :  { %v143_v43 = vadd.f32 %v142_v27, %v68_v39  ;;  %v154_v57 = vmax.f32 %v131_v54, 0.0 }
  0x8b   :  { %v133_v29 = vpop.f32.mrf.mxu0  ;;  %v158_v48 = vmax.f32 %v143_v43, 0.0 }
  0x8c   :  { %v134_v51 = vadd.f32 %v133_v29, %v53_v50  ;;  %v178_v63 = vpop.permute.xlu0 %177 }
  0x8e   :  { %v155_v56 = vmax.f32 %v134_v51, 0.0  ;;  %v183_v1 = vpop.permute.xlu1 %182 }
  0x90   :  { %v145_v28 = vpop.f32.mrf.mxu2 }
  0x91   :  { %v146_v40 = vadd.f32 %v145_v28, %v73_v31 }
  0x93   :  { %v136_v33 = vpop.f32.mrf.mxu0  ;;  %v159_v45 = vmax.f32 %v146_v40, 0.0 }
  0x94   :  { %v137_v49 = vadd.f32 %v136_v33, %v58_v47  ;;  %v242_v9 = vpop.permute.xlu0 %241 }
  0x96   :  { %v156_v55 = vmax.f32 %v137_v49, 0.0  ;;  %v247_v12 = vpop.permute.xlu1 %246 }
  0x98   :  { %v148_v32 = vpop.f32.mrf.mxu2 }
  0x99   :  { %v149_v37 = vadd.f32 %v148_v32, %v78_v35 }
  0x9b   :  { %v139_v42 = vpop.f32.mrf.mxu0  ;;  %v160_v44 = vmax.f32 %v149_v37, 0.0 }
  0x9c   :  { %v140_v46 = vadd.f32 %v139_v42, %v63_v34  ;;  %v257_v23 = vpop.permute.xlu0 %256  ;;  %v278_v34 = vstv %s512_s6 }
  0x9e   :  { %v157_v52 = vmax.f32 %v140_v46, 0.0 }
  0xa0   :  { %v151_v36 = vpop.f32.mrf.mxu2 }
  0xa1   :  { %v152_v38 = vadd.f32 %v151_v36, %v83_v30 }
  0xa3   :  { %v161_v41 = vmax.f32 %v152_v38, 0.0 }
  0xa5   :  { %210 = vmatpush.msra.mxu1 %v161_v41  ;;  %316 = vmatpush.msra.mxu3 %v161_v41 }
  0xa7   :  { %211 = vmatpush.msra.mxu1 %v160_v44  ;;  %317 = vmatpush.msra.mxu3 %v160_v44 }
  0xa9   :  { %212 = vmatpush.msra.mxu1 %v159_v45  ;;  %318 = vmatpush.msra.mxu3 %v159_v45 }
  0xab   :  { %213 = vmatpush.msra.mxu1 %v158_v48  ;;  %319 = vmatpush.msra.mxu3 %v158_v48 }
  0xad   :  { %214 = vmatpush.msra.mxu1 %v157_v52  ;;  %320 = vmatpush.msra.mxu3 %v157_v52 }
  0xaf   :  { %215 = vmatpush.msra.mxu1 %v156_v55  ;;  %321 = vmatpush.msra.mxu3 %v156_v55 }
  0xb1   :  { %216 = vmatpush.msra.mxu1 %v155_v56  ;;  %322 = vmatpush.msra.mxu3 %v155_v56 }
  0xb3   :  { %217 = vmatpush.msra.mxu1 %v154_v57  ;;  %323 = vmatpush.msra.mxu3 %v154_v57 }
  0xb4   :  { %311 = vmatmul.msk.f32.vlgmr.msra.gmra.mxu1 %vm85_vm0, %v162_v58  ;;  %312 = vmatmul.msk.f32.vlgmr.msra.gmra.mxu3 %vm85_vm0, %v163_v59 }
  0xbc   :  { %313 = vmatmul.msk.f32.gmra.mxu3 %vm85_vm0, %v164_v60 }
  0xc4   :  { %314 = vmatmul.msk.f32.gmra.mxu3 %vm85_vm0, %v165_v61 }
 0x131   :  { %v219_v3 = vpop.f32.mrf.mxu1 }
 0x132   :  { %v220_v5 = vadd.f32 %v219_v3, %v173_v62 }
 0x134   :  { %v231_v10 = vmax.f32 %v220_v5, 0.0 }
 0x136   :  { %v259_v15 = vmul.f32 %v242_v9, %v231_v10 }
 0x137   :  { %v222_v0 = vpop.f32.mrf.mxu3 }
 0x138   :  { %v223_v4 = vadd.f32 %v222_v0, %v178_v63  ;;  %v264_v20 = vsel %vm263_vm1, %v259_v15, 0.0 }
 0x13a   :  { %v232_v7 = vmax.f32 %v223_v4, 0.0 }
 0x13c   :  { %v260_v13 = vmul.f32 %v247_v12, %v232_v7 }
 0x13e   :  { %v265_v18 = vsel %vm263_vm1, %v260_v13, 0.0 }
 0x13f   :  { %v225_v6 = vpop.f32.mrf.mxu3  ;;  %v266_v24 = vadd.f32 %v265_v18, %v264_v20 }
 0x140   :  { %v226_v8 = vadd.f32 %v225_v6, %v183_v1 }
 0x142   :  { %v233_v11 = vmax.f32 %v226_v8, 0.0 }
 0x144   :  { %v261_v16 = vmul.f32 %v252_v14, %v233_v11 }
 0x146   :  { %v267_v21 = vsel %vm263_vm1, %v261_v16, 0.0 }
 0x147   :  { %v228_v17 = vpop.f32.mrf.mxu3  ;;  %v268_v26 = vadd.f32 %v267_v21, %v266_v24 }
 0x148   :  { %v229_v19 = vadd.f32 %v228_v17, %v188_v2 }
 0x14a   :  { %v234_v22 = vmax.f32 %v229_v19, 0.0 }
 0x14c   :  { %v262_v25 = vmul.f32 %v257_v23, %v234_v22 }
 0x14e   :  { %v269_v27 = vsel %vm263_vm1, %v262_v25, 0.0 }
 0x14f   :  { %v270_v28 = vadd.f32 %v269_v27, %v268_v26 }
 0x151   :  { %v271_v29 = vrot.slane %v270_v28, 4 }
 0x153   :  { %v272_v30 = vadd.f32 %v271_v29, %v270_v28 }
 0x155   :  { %v273_v31 = vrot.slane %v272_v30, 2 }
 0x157   :  { %v274_v32 = vadd.f32 %v273_v31, %v272_v30 }
 0x159   :  { %v275_v33 = vrot.slane %v274_v32, 1 }
 0x15b   :  { %v276_v35 = vadd.f32 %v275_v33, %v274_v32 }
 0x15d   :  { %v279_v36 = vadd.f32 %v278_v34, %v276_v35 }
 0x15f   :  { %v280_v37 = vmul.f32 0.5, %v279_v36 }
 0x161   :  { %329 = vtanh.f32 %v280_v37 }
 0x167   :  { %v330_v38 = vpop.eup %329 }
 0x168   :  { %v282_v39 = vmul.f32 0.5, %v330_v38 }
 0x16a   :  { %v283_v40 = vadd.f32 0.5, %v282_v39 }
 0x16c   :  { %285 = vst.msk [vmem:[#allocation3] sm:$0x1] %vm284_vm2, %v283_v40 }
 0x16d   :  { %296 = dma.vmem_to_hbm [thread:$0]  %s292_s0, 16, %s294_s10, [#allocation4]  }
 0x16e   :  { %355 = dma.done.wait [#allocation4], 16  }
 0x16f   :  { %356 = vsyncadd [#allocation4], 4294967280 }
 0x170   :  { %301 = vsyncpa [#allocation4], 1 }

</bundles_post_ra>
